<compile_context>
chip_gen: v7x
topology: tpu7x:2x2x1
jax: 0.10.0
libtpu: 0.0.40
codegen_flags: <defaults>
</compile_context>

<pallas_src>
import jax
import jax.numpy as jnp
from jax.experimental import pallas as pl
from jax.experimental.pallas import tpu as pltpu


def conv1x1_add_kernel(w_ref, x_ref, o_ref):
    # w_ref: SMEM (4,) raw conv weights, row-major: [w00, w01, w10, w11]
    # x_ref, o_ref: VMEM (N, 2, rows, 128) slabs; channel c of sample b at [b, c]
    w00 = w_ref[0] + 1.0   # residual +I folded here (scalar-ALU add, free slot)
    w01 = w_ref[1]
    w10 = w_ref[2]
    w11 = w_ref[3] + 1.0
    for b in range(x_ref.shape[0]):   # N is static and tiny -> unrolled
        x0 = x_ref[b, 0]
        x1 = x_ref[b, 1]
        o_ref[b, 0] = w00 * x0 + w01 * x1
        o_ref[b, 1] = w10 * x0 + w11 * x1


@jax.jit
def conv1x1_residual_add(x_nchw, weight):
    """x_nchw: (N, C, H, W) float32; weight: (C_out, C_in, 1, 1) float32."""
    n, c, h, w = x_nchw.shape
    c_out = weight.shape[0]
    assert weight.shape == (c_out, c, 1, 1)
    assert c_out == c == 2, "kernel is specialized for the 2->2 channel residual"

    lanes = 128
    s = h * w
    s_pad = ((s + lanes - 1) // lanes) * lanes   # pad instead of asserting
    rows = s_pad // lanes

    # Native-layout reshape (no NCHW->CNHW transpose, no HBM copy for N>1).
    x_flat = x_nchw.reshape(n, c, s)
    if s_pad != s:
        x_flat = jnp.pad(x_flat, ((0, 0), (0, 0), (0, s_pad - s)))
    x_slab = x_flat.reshape(n, c, rows, lanes)

    w_flat = weight.reshape(-1)   # raw weights; +I is applied inside the kernel

    out_slab = pl.pallas_call(
        conv1x1_add_kernel,
        out_shape=jax.ShapeDtypeStruct((n, c_out, rows, lanes), x_nchw.dtype),
        in_specs=[
            pl.BlockSpec(memory_space=pltpu.MemorySpace.SMEM),  # (4,) coefficients
            pl.BlockSpec(memory_space=pltpu.MemorySpace.VMEM),  # input slab
        ],
        out_specs=pl.BlockSpec(memory_space=pltpu.MemorySpace.VMEM),
        input_output_aliases={1: 0},   # output reuses the input slab's buffer
    )(w_flat, x_slab)

    out = out_slab.reshape(n, c_out, s_pad)
    if s_pad != s:
        out = out[..., :s]
    return out.reshape(n, c_out, h, w)


def _reference(x, w):
    return x + jax.lax.conv_general_dilated(
        x, w, window_strides=(1, 1), padding="VALID",
        dimension_numbers=("NCHW", "OIHW", "NCHW"),
    )


if __name__ == "__main__":
    key = jax.random.PRNGKey(0)
    kx, kw, kb = jax.random.split(key, 3)

    # Input consistent with the module: (1, 2, 64, 64), NCHW, float32
    x1 = jax.random.normal(kx, (1, 2, 64, 64), dtype=jnp.float32)

    # Deterministic Conv2d(2, 2, 1, bias=False) weight, shape (C_out, C_in, 1, 1)
    fan_in = 2 * 1 * 1
    bound = 1.0 / (fan_in ** 0.5)
    weight = jax.random.uniform(
        kw, (2, 2, 1, 1), dtype=jnp.float32, minval=-bound, maxval=bound
    )

    out = jax.block_until_ready(conv1x1_residual_add(x1, weight))
    assert jnp.allclose(out, _reference(x1, weight), atol=1e-5, rtol=1e-5), \
        "mismatch vs reference (N=1)"

    # Batched path (no transpose, batch unrolled in-kernel): N=2, smaller spatial
    xb = jax.random.normal(kb, (2, 2, 32, 32), dtype=jnp.float32)
    outb = jax.block_until_ready(conv1x1_residual_add(xb, weight))
    assert jnp.allclose(outb, _reference(xb, weight), atol=1e-5, rtol=1e-5), \
        "mismatch vs reference (N=2)"

    print("KERNEL_OK")
</pallas_src>

<mosaic_0001>
module attributes {stable_mosaic.version = 11 : i64} {
  func.func @conv1x1_add_kernel(%arg0: memref<4xf32, #tpu.memory_space<smem>>, %arg1: memref<1x2x32x128xf32, #tpu.memory_space<vmem>>, %arg2: memref<1x2x32x128xf32, #tpu.memory_space<vmem>>) attributes {dimension_semantics = [], scalar_prefetch = 0 : i64, scratch_operands = 0 : i64, tpu.core_type = #tpu.core_type<tc>} {
    %c0 = arith.constant 0 : index
    %0 = memref.load %arg0[%c0] : memref<4xf32, #tpu.memory_space<smem>>
    %cst = arith.constant 1.000000e+00 : f32
    %1 = arith.addf %0, %cst : f32
    %c1 = arith.constant 1 : index
    %2 = memref.load %arg0[%c1] : memref<4xf32, #tpu.memory_space<smem>>
    %c2 = arith.constant 2 : index
    %3 = memref.load %arg0[%c2] : memref<4xf32, #tpu.memory_space<smem>>
    %c3 = arith.constant 3 : index
    %4 = memref.load %arg0[%c3] : memref<4xf32, #tpu.memory_space<smem>>
    %cst_0 = arith.constant 1.000000e+00 : f32
    %5 = arith.addf %4, %cst_0 : f32
    %c0_1 = arith.constant 0 : index
    %c0_2 = arith.constant 0 : index
    %c0_3 = arith.constant 0 : index
    %c0_4 = arith.constant 0 : index
    %6 = vector.load %arg1[%c0_1, %c0_2, %c0_3, %c0_4] : memref<1x2x32x128xf32, #tpu.memory_space<vmem>>, vector<1x1x32x128xf32>
    %7 = vector.shape_cast %6 : vector<1x1x32x128xf32> to vector<32x128xf32>
    %c0_5 = arith.constant 0 : index
    %c1_6 = arith.constant 1 : index
    %c0_7 = arith.constant 0 : index
    %c0_8 = arith.constant 0 : index
    %8 = vector.load %arg1[%c0_5, %c1_6, %c0_7, %c0_8] : memref<1x2x32x128xf32, #tpu.memory_space<vmem>>, vector<1x1x32x128xf32>
    %9 = vector.shape_cast %8 : vector<1x1x32x128xf32> to vector<32x128xf32>
    %10 = vector.broadcast %1 : f32 to vector<32x128xf32>
    %11 = arith.mulf %10, %7 : vector<32x128xf32>
    %12 = vector.broadcast %2 : f32 to vector<32x128xf32>
    %13 = arith.mulf %12, %9 : vector<32x128xf32>
    %14 = arith.addf %11, %13 : vector<32x128xf32>
    %c0_9 = arith.constant 0 : index
    %c0_10 = arith.constant 0 : index
    %c0_11 = arith.constant 0 : index
    %c0_12 = arith.constant 0 : index
    %15 = vector.load %arg2[%c0_9, %c0_10, %c0_11, %c0_12] : memref<1x2x32x128xf32, #tpu.memory_space<vmem>>, vector<1x1x32x128xf32>
    %16 = vector.shape_cast %15 : vector<1x1x32x128xf32> to vector<32x128xf32>
    %17 = vector.shape_cast %14 : vector<32x128xf32> to vector<1x1x32x128xf32>
    tpu.vector_store %arg2[%c0_9, %c0_10, %c0_11, %c0_12], %17 {strides = array<i32>} : memref<1x2x32x128xf32, #tpu.memory_space<vmem>>, vector<1x1x32x128xf32>,
    %18 = vector.broadcast %3 : f32 to vector<32x128xf32>
    %19 = arith.mulf %18, %7 : vector<32x128xf32>
    %20 = vector.broadcast %5 : f32 to vector<32x128xf32>
    %21 = arith.mulf %20, %9 : vector<32x128xf32>
    %22 = arith.addf %19, %21 : vector<32x128xf32>
    %c0_13 = arith.constant 0 : index
    %c1_14 = arith.constant 1 : index
    %c0_15 = arith.constant 0 : index
    %c0_16 = arith.constant 0 : index
    %23 = vector.load %arg2[%c0_13, %c1_14, %c0_15, %c0_16] : memref<1x2x32x128xf32, #tpu.memory_space<vmem>>, vector<1x1x32x128xf32>
    %24 = vector.shape_cast %23 : vector<1x1x32x128xf32> to vector<32x128xf32>
    %25 = vector.shape_cast %22 : vector<32x128xf32> to vector<1x1x32x128xf32>
    tpu.vector_store %arg2[%c0_13, %c1_14, %c0_15, %c0_16], %25 {strides = array<i32>} : memref<1x2x32x128xf32, #tpu.memory_space<vmem>>, vector<1x1x32x128xf32>,
    return
  }
}

</mosaic_0001>

<bundles_post_ra>
// kernel: conv1x1_residual_add.1
= control target key start
LH: loop header
LB: loop body
LE: loop exit
PB: predicated region body
PF: predicated region fallthrough
CT: control target
= control target key end

     0   :  { %7 = vsyncpa [#allocation3], 0  ;;  %s174_s0 = inlined_call_operand.vmem [shape: f32[4], index: 0, kind: input, shape index: {}]   ;;  %s175_s1 = inlined_call_operand.vmem [shape: f32[1,2,32,128], index: 1, kind: input, shape index: {}, may-alias: {1,2}]   ;;  %s176_s2 = inlined_call_operand.vmem [shape: f32[1,2,32,128], index: 2, kind: output, shape index: {}, may-alias: {1,2}]  }
   0x1   :  { %s14_s11 = sshll.u32 %s174_s0, 4  ;;  %s15_s11 = int_to_ptr.vmem [resolvable:$true] %s14_s11 }
   0x2   :  { %s93_s12 = scalar_lea.vmem %s15_s11, 16  ;;  %p98_p1 = scmp.lt.s32.totalorder %s15_s11, %s15_s11 }
   0x3   :  { %p94_p0 = scmp.ne.s32.totalorder %s15_s11, %s93_s12  ;;  %p99_p2 = scmp.lt.s32.totalorder %s93_s12, %s93_s12 }
   0x5   :  { %p100_p3 = por %p99_p2, %p98_p1 }
   0x7   :  { %p101_p4 = pnand %p100_p3, %p94_p0 }
   0x9   :  { %104 = shalt.err (!%p101_p4)
}
   0xa   :  { %s107_s13 = smov [#allocation2]  }
   0xb   :  { %17 = dma.vmem_to_smem %s15_s11, 16, %s107_s13, [#allocation3]  }
   0xc   :  { %105 = dma.done.wait [#allocation3], 16  }
   0xd   :  { %106 = vsyncadd [#allocation3], 4294967280 }
   0xe   :  { %23 = sfence }
   0xf   :  { %s24_s14 = sld [smem:[#allocation2]]  ;;  %s81_s15 = sld [smem:[#allocation2 + $0x1]]  ;;  %v84_v0 = vld [vmem:[%s175_s1 + $0x20] sm:$0xff]  ;;  %v85_v1 = vld [vmem:[%s175_s1 + $0x28] sm:$0xff]  ;;  %v86_v2 = vld [vmem:[%s175_s1 + $0x30] sm:$0xff] }
  0x10   :  { %s82_s16 = sld [smem:[#allocation2 + $0x2]]  ;;  %s83_s17 = sld [smem:[#allocation2 + $0x3]]  ;;  %v87_v3 = vld [vmem:[%s175_s1 + $0x38] sm:$0xff]  ;;  %v30_v4 = vld [vmem:[%s175_s1] sm:$0xff]  ;;  %v31_v6 = vld [vmem:[%s175_s1 + $0x8] sm:$0xff] }
  0x11   :  { %v32_v7 = vld [vmem:[%s175_s1 + $0x10] sm:$0xff]  ;;  %v33_v8 = vld [vmem:[%s175_s1 + $0x18] sm:$0xff] }
  0x15   :  { %s25_s27 = sadd.f32 1.0, %s24_s14  ;;  %v44_v5 = vstv %s81_s15 }
  0x16   :  { %v45_v9 = vmul.f32 %v84_v0, %v44_v5  ;;  %v46_v10 = vmul.f32 %v85_v1, %v44_v5  ;;  %v47_v11 = vmul.f32 %v86_v2, %v44_v5  ;;  %v48_v12 = vmul.f32 %v87_v3, %v44_v5  ;;  %s29_s6 = sadd.f32 1.0, %s83_s17 }
  0x17   :  { %v39_v13 = vstv %s25_s27  ;;  %v57_v14 = vstv %s82_s16 }
  0x18   :  { %v40_v15 = vmul.f32 %v39_v13, %v30_v4  ;;  %v41_v16 = vmul.f32 %v39_v13, %v31_v6  ;;  %v42_v17 = vmul.f32 %v39_v13, %v32_v7  ;;  %v43_v18 = vmul.f32 %v39_v13, %v33_v8 }
  0x19   :  { %v58_v19 = vmul.f32 %v57_v14, %v30_v4  ;;  %v62_v20 = vstv %s29_s6  ;;  %v59_v21 = vmul.f32 %v57_v14, %v31_v6  ;;  %v60_v22 = vmul.f32 %v57_v14, %v32_v7 }
  0x1a   :  { %v49_v23 = vadd.f32 %v45_v9, %v40_v15  ;;  %v50_v24 = vadd.f32 %v46_v10, %v41_v16  ;;  %v51_v25 = vadd.f32 %v47_v11, %v42_v17  ;;  %v52_v26 = vadd.f32 %v48_v12, %v43_v18 }
  0x1b   :  { %v63_v27 = vmul.f32 %v84_v0, %v62_v20  ;;  %v64_v28 = vmul.f32 %v85_v1, %v62_v20  ;;  %v65_v29 = vmul.f32 %v86_v2, %v62_v20  ;;  %v61_v30 = vmul.f32 %v57_v14, %v33_v8 }
  0x1c   :  { %53 = vst [vmem:[%s176_s2] sm:$0xff] %v49_v23  ;;  %54 = vst [vmem:[%s176_s2 + $0x8] sm:$0xff] %v50_v24  ;;  %v66_v31 = vmul.f32 %v87_v3, %v62_v20 }
  0x1d   :  { %55 = vst [vmem:[%s176_s2 + $0x10] sm:$0xff] %v51_v25  ;;  %56 = vst [vmem:[%s176_s2 + $0x18] sm:$0xff] %v52_v26  ;;  %v67_v32 = vadd.f32 %v63_v27, %v58_v19  ;;  %v68_v33 = vadd.f32 %v64_v28, %v59_v21  ;;  %v69_v34 = vadd.f32 %v65_v29, %v60_v22 }
  0x1e   :  { %v70_v35 = vadd.f32 %v66_v31, %v61_v30 }
  0x1f   :  { %88 = vst [vmem:[%s176_s2 + $0x20] sm:$0xff] %v67_v32  ;;  %89 = vst [vmem:[%s176_s2 + $0x28] sm:$0xff] %v68_v33 }
  0x20   :  { %90 = vst [vmem:[%s176_s2 + $0x30] sm:$0xff] %v69_v34  ;;  %91 = vst [vmem:[%s176_s2 + $0x38] sm:$0xff] %v70_v35 }
  0x21   :  { %80 = vsyncpa [#allocation3], 1 }

</bundles_post_ra>
